<compile_context>
chip_gen: v5e
topology: v5e:2x2
jax: 0.10.0
libtpu: 0.0.40
codegen_flags: <defaults>
</compile_context>

<pallas_src>
import jax
import jax.numpy as jnp
import numpy as np
from jax.experimental import pallas as pl
from jax.experimental.pallas import tpu as pltpu

_EPS = 1e-8


def _pixel_norm_kernel(x_ref, o_ref):
    # block: (1, C, ts) -- C (reduction axis) on sublanes, spatial on lanes.
    x = x_ref[0].astype(jnp.float32)                      # (C, ts)
    mean_sq = jnp.mean(x * x, axis=0, keepdims=True)      # (1, ts)  XLU reduce
    inv = jax.lax.rsqrt(mean_sq + _EPS)                   # EUP rsqrt (free slot)
    o_ref[0] = (x * inv).astype(o_ref.dtype)              # VPU + lane-dense store


def _pick_spatial_tile(C, S, itemsize):
    """Largest lane-multiple tile dividing S while keeping one block <= ~2 MiB."""
    if S % 128 != 0:
        return S                       # exact full block (always legal per BlockSpec rules)
    budget = 2 * 1024 * 1024           # per-input-block bytes; x2 buffers + out stays tiny
    max_ts = max(128, (budget // max(1, C * itemsize)) // 128 * 128)
    ts = min(S, max_ts)
    while S % ts != 0:                 # S is a multiple of 128 -> terminates at >=128
        ts -= 128
    return ts


def pixel_norm(x):
    """PixelNorm over dim=1 of an (N, C, ...) array; matches the torch module."""
    orig_shape = x.shape
    N, C = x.shape[0], x.shape[1]
    S = int(np.prod(x.shape[2:], dtype=np.int64))          # 1 for 2-D inputs
    x3 = x.reshape(N, C, S)                                 # free reshape, no transpose

    ts = _pick_spatial_tile(C, S, jnp.dtype(x.dtype).itemsize)
    grid = (N, S // ts)

    out = pl.pallas_call(
        _pixel_norm_kernel,
        out_shape=jax.ShapeDtypeStruct((N, C, S), x.dtype),
        grid_spec=pltpu.PrefetchScalarGridSpec(
            num_scalar_prefetch=0,
            grid=grid,
            in_specs=[pl.BlockSpec((1, C, ts), lambda n, s: (n, 0, s))],
            out_specs=pl.BlockSpec((1, C, ts), lambda n, s: (n, 0, s)),
        ),
        compiler_params=pltpu.CompilerParams(
            dimension_semantics=("parallel", "parallel")),
    )(x3)
    return out.reshape(orig_shape)


def _pixel_norm_ref(x):
    x32 = x.astype(jnp.float32)
    inv = jax.lax.rsqrt(jnp.mean(x32 * x32, axis=1, keepdims=True) + _EPS)
    return (x32 * inv).astype(x.dtype)


if __name__ == "__main__":
    key = jax.random.PRNGKey(0)
    x = jax.random.normal(key, (2, 4, 16, 16), jnp.float32)   # NCHW, small shapes

    fwd = jax.jit(pixel_norm)
    y = fwd(x)
    jax.block_until_ready(y)
    assert y.shape == x.shape, y.shape

    y_ref = _pixel_norm_ref(x)
    np.testing.assert_allclose(np.asarray(y), np.asarray(y_ref),
                               rtol=1e-4, atol=1e-5)
    print("KERNEL_OK")
</pallas_src>

<mosaic_0001>
module attributes {stable_mosaic.version = 11 : i64} {
  func.func @_pixel_norm_kernel(%arg0: i32, %arg1: i32, %arg2: memref<1x4x256xf32, #tpu.memory_space<vmem>>, %arg3: memref<1x4x256xf32, #tpu.memory_space<vmem>>) attributes {dimension_semantics = [#tpu.dimension_semantics<parallel>, #tpu.dimension_semantics<parallel>], iteration_bounds = array<i64: 2, 1>, scalar_prefetch = 0 : i64, scratch_operands = 0 : i64, tpu.core_type = #tpu.core_type<tc>, window_params = [{transform_indices = @transform_0, window_bounds = array<i64: 1, 4, 256>}, {transform_indices = @transform_1, window_bounds = array<i64: 1, 4, 256>}]} {
    %c0 = arith.constant 0 : index
    %c0_0 = arith.constant 0 : index
    %c0_1 = arith.constant 0 : index
    %0 = vector.load %arg2[%c0, %c0_0, %c0_1] : memref<1x4x256xf32, #tpu.memory_space<vmem>>, vector<1x4x256xf32>
    %1 = vector.shape_cast %0 : vector<1x4x256xf32> to vector<4x256xf32>
    %2 = arith.mulf %1, %1 : vector<4x256xf32>
    %cst = arith.constant dense<0.000000e+00> : vector<256xf32>
    %3 = vector.multi_reduction <add>, %2, %cst [0] : vector<4x256xf32> to vector<256xf32>
    %4 = vector.shape_cast %3 : vector<256xf32> to vector<1x256xf32>
    %cst_2 = arith.constant 4.000000e+00 : f32
    %5 = vector.broadcast %cst_2 : f32 to vector<1x256xf32>
    %6 = arith.divf %4, %5 : vector<1x256xf32>
    %cst_3 = arith.constant 9.99999993E-9 : f32
    %7 = vector.broadcast %cst_3 : f32 to vector<1x256xf32>
    %8 = arith.addf %6, %7 : vector<1x256xf32>
    %9 = math.rsqrt %8 : vector<1x256xf32>
    %10 = vector.broadcast %9 : vector<1x256xf32> to vector<4x256xf32>
    %11 = arith.mulf %1, %10 : vector<4x256xf32>
    %c0_4 = arith.constant 0 : index
    %c0_5 = arith.constant 0 : index
    %c0_6 = arith.constant 0 : index
    %12 = vector.load %arg3[%c0_4, %c0_5, %c0_6] : memref<1x4x256xf32, #tpu.memory_space<vmem>>, vector<1x4x256xf32>
    %13 = vector.shape_cast %12 : vector<1x4x256xf32> to vector<4x256xf32>
    %14 = vector.shape_cast %11 : vector<4x256xf32> to vector<1x4x256xf32>
    tpu.vector_store %arg3[%c0_4, %c0_5, %c0_6], %14 {strides = array<i32>} : memref<1x4x256xf32, #tpu.memory_space<vmem>>, vector<1x4x256xf32>,
    return
  }
  func.func @transform_0(%arg0: i32, %arg1: i32) -> (i32, i32, i32) {
    %c0_i32 = arith.constant 0 : i32
    %c0_i32_0 = arith.constant 0 : i32
    return %arg0, %c0_i32, %arg1 : i32, i32, i32
  }
  func.func @transform_1(%arg0: i32, %arg1: i32) -> (i32, i32, i32) {
    %c0_i32 = arith.constant 0 : i32
    %c0_i32_0 = arith.constant 0 : i32
    return %arg0, %c0_i32, %arg1 : i32, i32, i32
  }
}

</mosaic_0001>

<bundles_post_ra>
// kernel: pixel_norm.1
= control target key start
LH: loop header
LB: loop body
LE: loop exit
PB: predicated region body
PF: predicated region fallthrough
CT: control target
= control target key end

     0   :  { %s383_s6 = smov 0   ;;  %s385_s7 = smov 0   ;;  %s426_s0 = inlined_call_operand.vmem [shape: f32[2,4,256], index: 0, kind: input, shape index: {}]   ;;  %s427_s1 = inlined_call_operand.vmem [shape: f32[2,4,256], index: 1, kind: output, shape index: {}]  }
   0x1   :  { %s387_s8 = smov 0  }
   0x2 LB: > { %s23_s9 = sadd.s32 1, %s366_s7  ;;  %p308_p0 = scmp.ge.s32.totalorder %s370_s8, 1  ;;  %s370_s8 = sphi %s387_s8, %s11_s8   ;;  %s366_s7 = sphi %s385_s7, %s429_s7   ;;  %s362_s6 = sphi %s383_s6, %s428_s6  }
   0x3   : > { %p25_p1 = scmp.ge.s32.totalorder %s23_s9, 2  ;;  %p108_p2 = scmp.lt.s32.totalorder %s370_s8, 3 }
   0x5   : > { %s431_s9 = smov (%p25_p1, %s23_s9), 0  ;;  %p109_p3 = pnand %p308_p0, %p108_p2 }
   0x6   : > { %p137_p4 = scmp.lt.s32.totalorder (!%p109_p3), %s362_s6, 1 }
   0x7   : > { %112 = sbr.rel (%p109_p3) target bundleno = 68 (0x44), region = 24 }
   0xc   : > { %s433_s6 = smov (!%p137_p4, %s362_s6), 1  ;;  %v372_v0 = vmov 4.0   ;;  %vm164_vm0 = vcmask 1043456  }
   0xd   : > { %342 = vrcp.f32 %v372_v0  ;;  %s315_s10 = sshll.u32 %s433_s6, 3 }
   0xe   : > { %s144_s13 = scalar_lea.vmem %s426_s0, %s315_s10  ;;  %s154_s16 = scalar_lea.vmem %s427_s1, %s315_s10 }
   0xf   : > { %v156_v1 = vld [vmem:[%s144_s13] sm:$0xff] }
  0x10   : > { %v157_v2 = vmul.f32 %v156_v1, %v156_v1 }
  0x12   : > { %159 = vst [vmem:[#allocation1] ss:$2 sm:$0xff] %v157_v2 }
  0x13   : > { %v343_v3 = vpop.eup %342 }
  0x14   : > { %v180_v4 = vmul.f32 4.0, %v343_v3  ;;  %vm184_vm1 = vweird.f32 %v343_v3 }
  0x16   : > { %v181_v5 = vsub.f32 1.0, %v180_v4 }
  0x18   : > { %v182_v12 = vmul.f32 %v343_v3, %v181_v5 }
  0x19   : > { %v160_v6 = vld.sshfl [vmem:[#allocation1] sm:$0xff pattern:$0x75316420]  ;;  %v161_v7 = vld.sshfl [vmem:[#allocation1 + $0x8] sm:$0xff pattern:$0x75316420] }
  0x1a   : > { %v165_v8 = vsel %vm164_vm0, %v160_v6, 0.0  ;;  %v172_v9 = vsel %vm164_vm0, %v161_v7, 0.0  ;;  %v183_v17 = vadd.f32 %v343_v3, %v182_v12 }
  0x1b   : > { %v166_v10 = vrot.slane %v165_v8, 4  ;;  %v173_v11 = vrot.slane %v172_v9, 4 }
  0x1c   : > { %v185_v22 = vsel %vm184_vm1, %v343_v3, %v183_v17 }
  0x1d   : > { %v167_v13 = vadd.f32 %v166_v10, %v165_v8  ;;  %v174_v14 = vadd.f32 %v173_v11, %v172_v9 }
  0x1f   : > { %v168_v15 = vrot.slane %v167_v13, 2  ;;  %v175_v16 = vrot.slane %v174_v14, 2 }
  0x21   : > { %v169_v18 = vadd.f32 %v168_v15, %v167_v13  ;;  %v176_v19 = vadd.f32 %v175_v16, %v174_v14 }
  0x23   : > { %v170_v20 = vrot.slane %v169_v18, 1  ;;  %v177_v21 = vrot.slane %v176_v19, 1 }
  0x25   : > { %v171_v23 = vadd.f32 %v170_v20, %v169_v18  ;;  %v178_v24 = vadd.f32 %v177_v21, %v176_v19 }
  0x27   : > { %v186_v25 = vmul.f32 %v185_v22, %v171_v23  ;;  %v187_v26 = vmul.f32 %v185_v22, %v178_v24 }
  0x29   : > { %v188_v27 = vadd.f32 1e-08, %v186_v25  ;;  %v189_v28 = vadd.f32 1e-08, %v187_v26 }
  0x2b   : > { %344 = vrsqrt.f32 %v188_v27  ;;  %vm206_vm4 = vweird.f32 %v189_v28  ;;  %vm196_vm6 = vweird.f32 %v188_v27 }
  0x2c   : > { %346 = vrsqrt.f32 %v189_v28 }
  0x31   : > { %v345_v29 = vpop.eup %344 }
  0x32   : > { %v347_v30 = vpop.eup %346  ;;  %v191_v31 = vmul.f32 %v345_v29, %v188_v27  ;;  %vm197_vm3 = vweird.f32 %v345_v29 }
  0x33   : > { %v201_v32 = vmul.f32 %v347_v30, %v189_v28  ;;  %vm207_vm2 = vweird.f32 %v347_v30  ;;  %vm198_vm7 = vmor %vm196_vm6, %vm197_vm3 }
  0x34   : > { %v192_v33 = vmul.f32 %v345_v29, %v191_v31  ;;  %vm208_vm5 = vmor %vm206_vm4, %vm207_vm2 }
  0x35   : > { %v202_v34 = vmul.f32 %v347_v30, %v201_v32 }
  0x36   : > { %v193_v35 = vmul.f32 0.5, %v192_v33 }
  0x37   : > { %v203_v36 = vmul.f32 0.5, %v202_v34 }
  0x38   : > { %v194_v37 = vsub.f32 1.5, %v193_v35 }
  0x39   : > { %v204_v38 = vsub.f32 1.5, %v203_v36 }
  0x3a   : > { %v195_v39 = vmul.f32 %v345_v29, %v194_v37 }
  0x3b   : > { %v205_v40 = vmul.f32 %v347_v30, %v204_v38 }
  0x3c   : > { %v199_v43 = vsel %vm198_vm7, %v345_v29, %v195_v39 }
  0x3d   : > { %v209_v41 = vsel %vm208_vm5, %v347_v30, %v205_v40 }
  0x3e   : > { %v212_v42 = vrot.slane %v209_v41, 4 }
  0x40   : > { %v213_v44 = vsel %vm164_vm0, %v199_v43, %v212_v42 }
  0x41   : > { %v215_v45 = vmul.f32 %v213_v44, %v156_v1 }
  0x43   : > { %216 = vst [vmem:[%s154_s16] sm:$0xff] %v215_v45 }
  0x44 PF: > { %s11_s8 = sadd.s32 1, %s370_s8   ;;  %s428_s6 = smov %s366_s7 }
  0x45   : > { %p8_p5 = scmp.ge.s32.totalorder %s11_s8, 4   ;;  %s429_s7 = smov %s431_s9 }
  0x47   :  { %10 = sbr.rel (!%p8_p5) target bundleno = 2 (0x2), region = 54 }

</bundles_post_ra>
